<compile_context>
chip_gen: v5e
topology: v5e:2x2
jax: 0.10.0
libtpu: 0.0.40
codegen_flags: <defaults>
</compile_context>

<pallas_src>
import jax
import jax.numpy as jnp
from jax.experimental import pallas as pl
from jax.experimental.pallas import tpu as pltpu


def _head_kernel(x_ref, p_ref, out_ref):
    # p_ref: [D+1, O] — rows 0..D-1 are the fused weight [w1|w2], row D is the fused bias.
    # Single fused matmul on the MXU (f32 accumulate), one bias add, one store.
    x = x_ref[...]                       # [B, D]
    p = p_ref[...]                       # [D+1, O]
    w = p[:-1, :]                        # [D, O]
    b = p[-1:, :]                        # [1, O]
    acc = jnp.dot(x, w, preferred_element_type=jnp.float32)   # [B, O]
    out_ref[...] = (acc + b.astype(jnp.float32)).astype(out_ref.dtype)


def head_forward(x, w1, b1, w2, b2):
    """x: [B, D]; w1: [D, out1]; b1: [1, out1]; w2: [D, 3]; b2: [1, 3].

    Returns [out, out2] matching Head.forward with REQUIRE_AUX=True (eval mode).
    """
    B, D = x.shape
    out1 = w1.shape[1]
    out2 = w2.shape[1]
    out_total = out1 + out2

    # Pack all parameters into ONE contiguous buffer: [D+1, out1+out2]
    # (last row = fused bias). In a real deployment this packing is done once at
    # weight-load time; under jit it is a cheap, fused host-side layout op.
    w_fused = jnp.concatenate([w1, w2], axis=1)          # [D, O]
    b_fused = jnp.concatenate([b1, b2], axis=1)          # [1, O]
    params = jnp.concatenate([w_fused, b_fused], axis=0)  # [D+1, O]

    out = pl.pallas_call(
        _head_kernel,
        out_shape=jax.ShapeDtypeStruct((B, out_total), x.dtype),
        # No grid: single invocation, full-array blocks resident in VMEM.
        in_specs=[
            pl.BlockSpec(memory_space=pltpu.MemorySpace.VMEM),  # x
            pl.BlockSpec(memory_space=pltpu.MemorySpace.VMEM),  # packed params
        ],
        out_specs=pl.BlockSpec(memory_space=pltpu.MemorySpace.VMEM),
    )(x, params)

    # Split the fused output back into the module's two heads (outside the kernel).
    return [out[:, :out1], out[:, out1:]]


head_forward_jit = jax.jit(head_forward)


if __name__ == "__main__":
    key = jax.random.PRNGKey(0)
    k_x, k_w1, k_b1, k_w2, k_b2 = jax.random.split(key, 5)

    # Shapes implied by the module: x is a feature vector per sample.
    B = 8          # batch
    D = 32         # vector_dim
    OUT1 = 1       # out_units for cfg.DATA.DATA_TYPE in ['simple', 'aux']
    OUT2 = 3       # aux_fc output units (cfg.DATA.REQUIRE_AUX = True)

    # Deterministic parameter init (PyTorch Linear-style uniform(-1/sqrt(D), 1/sqrt(D))).
    bound = 1.0 / jnp.sqrt(jnp.float32(D))
    x = jax.random.normal(k_x, (B, D), dtype=jnp.float32)
    w1 = jax.random.uniform(k_w1, (D, OUT1), dtype=jnp.float32, minval=-bound, maxval=bound)
    b1 = jax.random.uniform(k_b1, (1, OUT1), dtype=jnp.float32, minval=-bound, maxval=bound)
    w2 = jax.random.uniform(k_w2, (D, OUT2), dtype=jnp.float32, minval=-bound, maxval=bound)
    b2 = jax.random.uniform(k_b2, (1, OUT2), dtype=jnp.float32, minval=-bound, maxval=bound)

    out1, out2 = head_forward_jit(x, w1, b1, w2, b2)
    jax.block_until_ready(out1)
    jax.block_until_ready(out2)

    # Pure-JAX reference (Dropout is identity in eval mode).
    ref1 = x @ w1 + b1
    ref2 = x @ w2 + b2
    assert out1.shape == (B, OUT1) and out2.shape == (B, OUT2)
    assert jnp.allclose(out1, ref1, atol=1e-5), "fc output mismatch"
    assert jnp.allclose(out2, ref2, atol=1e-5), "aux_fc output mismatch"

    print("KERNEL_OK")
</pallas_src>

<mosaic_0001>
module attributes {stable_mosaic.version = 11 : i64} {
  func.func @_head_kernel(%arg0: memref<8x32xf32, #tpu.memory_space<vmem>>, %arg1: memref<33x4xf32, #tpu.memory_space<vmem>>, %arg2: memref<8x4xf32, #tpu.memory_space<vmem>>) attributes {dimension_semantics = [], scalar_prefetch = 0 : i64, scratch_operands = 0 : i64, tpu.core_type = #tpu.core_type<tc>} {
    %c0 = arith.constant 0 : index
    %c0_0 = arith.constant 0 : index
    %0 = vector.load %arg0[%c0, %c0_0] : memref<8x32xf32, #tpu.memory_space<vmem>>, vector<8x32xf32>
    %c0_1 = arith.constant 0 : index
    %c0_2 = arith.constant 0 : index
    %1 = vector.load %arg1[%c0_1, %c0_2] : memref<33x4xf32, #tpu.memory_space<vmem>>, vector<33x4xf32>
    %2 = vector.extract_strided_slice %1 {offsets = [0, 0], sizes = [32, 4], strides = [1, 1]} : vector<33x4xf32> to vector<32x4xf32>
    %3 = vector.extract_strided_slice %1 {offsets = [32, 0], sizes = [1, 4], strides = [1, 1]} : vector<33x4xf32> to vector<1x4xf32>
    %cst = arith.constant dense<0.000000e+00> : vector<8x4xf32>
    %4 = tpu.matmul %0, %2, %cst {dimension_numbers = #tpu.dot_dimension_numbers<[1], [0], [0], [1], [0, 0, 1, 1], [], []>} : vector<8x32xf32>, vector<32x4xf32>, vector<8x4xf32> -> vector<8x4xf32>
    %5 = vector.broadcast %3 : vector<1x4xf32> to vector<8x4xf32>
    %6 = arith.addf %4, %5 : vector<8x4xf32>
    %c0_3 = arith.constant 0 : index
    %c0_4 = arith.constant 0 : index
    %7 = vector.load %arg2[%c0_3, %c0_4] : memref<8x4xf32, #tpu.memory_space<vmem>>, vector<8x4xf32>
    tpu.vector_store %arg2[%c0_3, %c0_4], %6 {strides = array<i32>} : memref<8x4xf32, #tpu.memory_space<vmem>>, vector<8x4xf32>,
    return
  }
}

</mosaic_0001>

<bundles_post_ra>
// kernel: head_forward.1
= control target key start
LH: loop header
LB: loop body
LE: loop exit
PB: predicated region body
PF: predicated region fallthrough
CT: control target
= control target key end

     0   :  { %vm18_vm0 = vcmask 261120   ;;  %vm42_vm1 = vcmask 31744   ;;  %s86_s1 = inlined_call_operand.vmem [shape: f32[33,4], index: 1, kind: input, shape index: {}]   ;;  %s87_s0 = inlined_call_operand.vmem [shape: f32[8,32], index: 0, kind: input, shape index: {}]   ;;  %s88_s2 = inlined_call_operand.vmem [shape: f32[8,4], index: 2, kind: output, shape index: {}]  }
   0x1   :  { %v15_v0 = vld [vmem:[%s86_s1 + $0x18] sm:$0xff]  ;;  %v14_v1 = vld [vmem:[%s86_s1 + $0x10] sm:$0xff]  ;;  %v13_v2 = vld [vmem:[%s86_s1 + $0x8] sm:$0xff] }
   0x2   :  { %34 = vmatpush.msra.mxu0 %v15_v0  ;;  %v12_v3 = vld [vmem:[%s86_s1] sm:$0xff] }
   0x3   :  { %v11_v4 = vld [vmem:[%s87_s0] sm:$0xff] }
   0x4   :  { %35 = vmatpush.msra.mxu0 %v14_v1  ;;  %v49_v5 = vld [vmem:[%s86_s1 + $0x20] ss:$0 sm:$0xff] }
   0x6   :  { %36 = vmatpush.msra.mxu0 %v13_v2 }
   0x8   :  { %37 = vmatpush.msra.mxu0 %v12_v3 }
   0x9   :  { %48 = vmatmul.msk.f32.vlgmr.msra.gmra.mxu0 %vm18_vm0, %v11_v4 }
  0x86   :  { %v39_v6 = vpop.f32.mrf.mxu0 }
  0x87   :  { %v40_v7 = vadd.f32 %v49_v5, %v39_v6 }
  0x89   :  { %43 = vst.msk [vmem:[%s88_s2] sm:$0xff] %vm42_vm1, %v40_v7 }

</bundles_post_ra>
